<compile_context>
chip_gen: v7x
topology: tpu7x:2x2x1
jax: 0.10.0
libtpu: 0.0.40
codegen_flags: <defaults>
</compile_context>

<pallas_src>
import jax
import jax.numpy as jnp
from jax.experimental import pallas as pl
from jax.experimental.pallas import tpu as pltpu


def _round_up(x, m):
    return ((x + m - 1) // m) * m


def _vmem_capacity_bytes():
    try:
        return int(pltpu.get_tpu_info().vmem_capacity_bytes)
    except Exception:
        return 64 << 20  # conservative default (v7x per-TensorCore capacity)


# -----------------------------------------------------------------------------
# Kernel
# -----------------------------------------------------------------------------
def _mlp_kernel(x_ref, wgu_ref, wd_ref, o_ref, acc_ref):
    # x_ref:   (tm, H)        activation tile (compute dtype)
    # wgu_ref: (H, 2*ti)      fused [gate | up] weight tile for this I-block
    # wd_ref:  (ti, H)        down-proj weight tile for this I-block
    # acc_ref: (tm, H) f32    accumulator over the I (reduction) grid axis
    ti = wd_ref.shape[0]
    i = pl.program_id(1)

    x = x_ref[...]
    # One MXU pass over x yields both gate and up projections (f32 results).
    gu = jnp.dot(x, wgu_ref[...], preferred_element_type=jnp.float32)
    g = gu[:, :ti]          # ti is a multiple of 128 -> lane-tile aligned split
    u = gu[:, ti:]
    # SiLU in f32 (VPU mul + EUP sigmoid); cast down only for the 2nd MXU pass.
    h = (g * jax.nn.sigmoid(g)) * u
    partial = jnp.dot(
        h.astype(wd_ref.dtype), wd_ref[...], preferred_element_type=jnp.float32
    )

    @pl.when(i == 0)
    def _():
        acc_ref[...] = partial          # assign on first step (no zero+add pass)

    @pl.when(i != 0)
    def _():
        acc_ref[...] += partial

    @pl.when(i == pl.num_programs(1) - 1)
    def _():
        o_ref[...] = acc_ref[...].astype(o_ref.dtype)


# -----------------------------------------------------------------------------
# Tile planning (generation-aware VMEM budgeting)
# -----------------------------------------------------------------------------
def plan_mlp_tiles(H, I, *, tm=512, ti=512, compute_dtype=jnp.bfloat16,
                   out_dtype=jnp.float32):
    cbytes = jnp.dtype(compute_dtype).itemsize
    obytes = jnp.dtype(out_dtype).itemsize
    row_align = 16 if cbytes < 4 else 8           # bf16 packs (16,128) per vreg
    vmem_cap = _vmem_capacity_bytes()
    budget = max(vmem_cap - (4 << 20), 16 << 20)  # leave compiler headroom

    tm = _round_up(max(row_align, int(tm)), row_align)
    # ti: multiple of 128, never silently falling back to ti = I.
    ti = max(128, (min(int(ti), _round_up(I, 128)) // 128) * 128)

    def est(tm_, ti_, act_bufs_):
        return (2 * (H * 2 * ti_ + ti_ * H) * cbytes        # weight tiles, double-buffered
                + act_bufs_ * tm_ * H * (cbytes + obytes)   # x + out tiles
                + tm_ * H * 4                               # f32 accumulator scratch
                + tm_ * ti_ * (8 + 4 + cbytes)              # gu / h / h-cast intermediates
                + (2 << 20))                                 # Mosaic internal slack

    act_bufs = 2
    while est(tm, ti, act_bufs) > budget:
        if act_bufs == 2:
            act_bufs = 1          # x/out change once per m-block; 1 buffer is enough
        elif ti > 128:
            ti //= 2
        elif tm > row_align:
            tm = max(row_align, _round_up(tm // 2, row_align))
        else:
            break

    vmem_limit = int(min(max(est(tm, ti, act_bufs), 32 << 20), budget))
    return {
        "tm": tm, "ti": ti, "act_bufs": act_bufs, "vmem_limit": vmem_limit,
        "row_align": row_align, "compute_dtype": compute_dtype,
    }


# -----------------------------------------------------------------------------
# One-time weight preparation (hoist to parameter-load time)
# -----------------------------------------------------------------------------
def prepare_mlp_weights(w_gate, w_up, w_down, plan):
    """PyTorch nn.Linear weights are [out, in]. Pre-transpose to [in, out],
    zero-pad I to a ti multiple, and store the fused gate|up weight as
    (n_i, H, 2*ti) so each I-block is one contiguous, linear DMA stream."""
    compute_dtype = plan["compute_dtype"]
    ti = plan["ti"]
    I, H = w_gate.shape
    I_pad = _round_up(I, ti)

    wg_t = w_gate.T.astype(compute_dtype)   # (H, I)
    wu_t = w_up.T.astype(compute_dtype)     # (H, I)
    wd_t = w_down.T.astype(compute_dtype)   # (I, H)
    if I_pad != I:
        pad = I_pad - I                      # zero pad: silu(0)*0 = 0 -> no effect
        wg_t = jnp.pad(wg_t, ((0, 0), (0, pad)))
        wu_t = jnp.pad(wu_t, ((0, 0), (0, pad)))
        wd_t = jnp.pad(wd_t, ((0, pad), (0, 0)))

    n_i = I_pad // ti
    wg_blk = wg_t.reshape(H, n_i, ti).transpose(1, 0, 2)   # (n_i, H, ti)
    wu_blk = wu_t.reshape(H, n_i, ti).transpose(1, 0, 2)   # (n_i, H, ti)
    wgu = jnp.concatenate([wg_blk, wu_blk], axis=2)        # (n_i, H, 2*ti)
    # TODO(synk): optional v7x path — pre-quantize weights to fp8 with
    # per-block scales and rescale in the accumulator epilogue.
    return wgu, wd_t


# -----------------------------------------------------------------------------
# Forward pass on prepared weights
# -----------------------------------------------------------------------------
def mlp_forward_prepared(x, wgu, wd_t, plan):
    B, S, H = x.shape
    n_i, H_w, two_ti = wgu.shape
    ti = two_ti // 2
    I_pad = wd_t.shape[0]
    assert H_w == H and n_i * ti == I_pad

    compute_dtype = plan["compute_dtype"]
    cbytes = jnp.dtype(compute_dtype).itemsize
    obytes = jnp.dtype(x.dtype).itemsize
    row_align = plan["row_align"]

    M = B * S
    tm = max(row_align, min(plan["tm"], _round_up(M, row_align)))
    M_pad = _round_up(M, tm)
    n_m = M_pad // tm

    x2d = x.reshape(M, H).astype(compute_dtype)
    if M_pad != M:
        x2d = jnp.pad(x2d, ((0, M_pad - M), (0, 0)))

    cost = pl.CostEstimate(
        flops=6 * M_pad * H * I_pad,
        transcendentals=M_pad * I_pad,
        # weights are re-streamed from HBM once per m-block
        bytes_accessed=(M_pad * H * (cbytes + obytes)
                        + n_m * 3 * H * I_pad * cbytes),
    )

    # x / out blocks only change once per m-block; single-buffer them when the
    # VMEM plan says space is tight (e.g. v7x 64 MiB).
    if plan["act_bufs"] == 2:
        x_spec = pl.BlockSpec((tm, H), lambda m, i: (m, 0))
        out_spec = pl.BlockSpec((tm, H), lambda m, i: (m, 0))
    else:
        x_spec = pl.BlockSpec((tm, H), lambda m, i: (m, 0),
                              pipeline_mode=pl.Buffered(plan["act_bufs"]))
        out_spec = pl.BlockSpec((tm, H), lambda m, i: (m, 0),
                                pipeline_mode=pl.Buffered(plan["act_bufs"]))

    # TODO(synk): v7x decode (n_m == 1) uses only one of the two TensorCores;
    # split the I reduction across a core-parallel axis with two partial
    # accumulators + a final add to use both.
    out2d = pl.pallas_call(
        _mlp_kernel,
        out_shape=jax.ShapeDtypeStruct((M_pad, H), x.dtype),
        grid_spec=pltpu.PrefetchScalarGridSpec(
            num_scalar_prefetch=0,
            grid=(n_m, n_i),  # reduction (I) axis last
            in_specs=[
                x_spec,
                # fused gate|up: contiguous (H, 2*ti) block per I-step
                pl.BlockSpec((None, H, 2 * ti), lambda m, i: (i, 0, 0)),
                # down projection block (rows are contiguous in (I_pad, H))
                pl.BlockSpec((ti, H), lambda m, i: (i, 0)),
            ],
            out_specs=out_spec,
            scratch_shapes=[pltpu.VMEM((tm, H), jnp.float32)],
        ),
        compiler_params=pltpu.CompilerParams(
            dimension_semantics=("parallel", "arbitrary"),
            vmem_limit_bytes=plan["vmem_limit"],
        ),
        cost_estimate=cost,
    )(x2d, wgu, wd_t)

    if M_pad != M:
        out2d = out2d[:M]
    return out2d.reshape(B, S, H)


def mlp_forward(x, w_gate, w_up, w_down, *, tm=512, ti=512,
                compute_dtype=jnp.bfloat16):
    """Convenience wrapper. In a real model, call plan_mlp_tiles +
    prepare_mlp_weights once at parameter-load time (as __main__ does) and
    reuse the prepared weights across forward calls."""
    plan = plan_mlp_tiles(x.shape[-1], w_gate.shape[0], tm=tm, ti=ti,
                          compute_dtype=compute_dtype, out_dtype=x.dtype)
    wgu, wd_t = prepare_mlp_weights(w_gate, w_up, w_down, plan)
    return mlp_forward_prepared(x, wgu, wd_t, plan)


def mlp_reference(x, w_gate, w_up, w_down):
    g = x @ w_gate.T
    u = x @ w_up.T
    return (jax.nn.silu(g) * u) @ w_down.T


if __name__ == "__main__":
    B, S, H, I = 2, 8, 32, 64

    key = jax.random.PRNGKey(0)
    kx, kg, ku, kd = jax.random.split(key, 4)

    x = jax.random.normal(kx, (B, S, H), dtype=jnp.float32)
    # PyTorch nn.Linear weight layout: [out_features, in_features]
    w_gate = jax.random.normal(kg, (I, H), dtype=jnp.float32) * (1.0 / H ** 0.5)
    w_up = jax.random.normal(ku, (I, H), dtype=jnp.float32) * (1.0 / H ** 0.5)
    w_down = jax.random.normal(kd, (H, I), dtype=jnp.float32) * (1.0 / I ** 0.5)

    ref = mlp_reference(x, w_gate, w_up, w_down)

    # f32 compute path (prep hoisted out of the forward call): tight tolerance.
    plan_f32 = plan_mlp_tiles(H, I, compute_dtype=jnp.float32, out_dtype=x.dtype)
    wgu_f32, wd_f32 = prepare_mlp_weights(w_gate, w_up, w_down, plan_f32)
    out_f32 = jax.block_until_ready(
        mlp_forward_prepared(x, wgu_f32, wd_f32, plan_f32))
    assert out_f32.shape == (B, S, H)
    assert jnp.allclose(out_f32, ref, atol=1e-4, rtol=1e-4), "f32 mismatch"

    # bf16 matmuls + f32 accumulation (production mixed-precision config).
    plan_bf16 = plan_mlp_tiles(H, I, compute_dtype=jnp.bfloat16, out_dtype=x.dtype)
    wgu_bf16, wd_bf16 = prepare_mlp_weights(w_gate, w_up, w_down, plan_bf16)
    out_bf16 = jax.block_until_ready(
        mlp_forward_prepared(x, wgu_bf16, wd_bf16, plan_bf16))
    assert out_bf16.shape == (B, S, H)
    assert jnp.allclose(out_bf16, ref, atol=1e-1, rtol=1e-1), "bf16 mismatch"

    print("KERNEL_OK")
</pallas_src>

<mosaic_0001>
module attributes {stable_mosaic.version = 11 : i64} {
  func.func @_mlp_kernel(%arg0: i32, %arg1: i32, %arg2: memref<16x32xf32, #tpu.memory_space<vmem>>, %arg3: memref<1x32x256xf32, #tpu.memory_space<vmem>>, %arg4: memref<128x32xf32, #tpu.memory_space<vmem>>, %arg5: memref<16x32xf32, #tpu.memory_space<vmem>>, %arg6: memref<16x32xf32, #tpu.memory_space<vmem>>) attributes {dimension_semantics = [#tpu.dimension_semantics<parallel>, #tpu.dimension_semantics<arbitrary>], iteration_bounds = array<i64: 1, 1>, scalar_prefetch = 0 : i64, scratch_operands = 1 : i64, tpu.core_type = #tpu.core_type<tc>, window_params = [{transform_indices = @transform_0, window_bounds = array<i64: 16, 32>}, {transform_indices = @transform_1, window_bounds = array<i64: 1, 32, 256>}, {transform_indices = @transform_2, window_bounds = array<i64: 128, 32>}, {transform_indices = @transform_3, window_bounds = array<i64: 16, 32>}]} {
    %c0 = arith.constant 0 : index
    %c0_0 = arith.constant 0 : index
    %0 = vector.load %arg2[%c0, %c0_0] : memref<16x32xf32, #tpu.memory_space<vmem>>, vector<16x32xf32>
    %c0_1 = arith.constant 0 : index
    %c0_2 = arith.constant 0 : index
    %c0_3 = arith.constant 0 : index
    %1 = vector.load %arg3[%c0_1, %c0_2, %c0_3] : memref<1x32x256xf32, #tpu.memory_space<vmem>>, vector<1x32x256xf32>
    %2 = vector.shape_cast %1 : vector<1x32x256xf32> to vector<32x256xf32>
    %cst = arith.constant dense<0.000000e+00> : vector<16x256xf32>
    %3 = tpu.matmul %0, %2, %cst {dimension_numbers = #tpu.dot_dimension_numbers<[1], [0], [0], [1], [0, 0, 1, 1], [], []>} : vector<16x32xf32>, vector<32x256xf32>, vector<16x256xf32> -> vector<16x256xf32>
    %4 = vector.extract_strided_slice %3 {offsets = [0, 0], sizes = [16, 128], strides = [1, 1]} : vector<16x256xf32> to vector<16x128xf32>
    %5 = vector.extract_strided_slice %3 {offsets = [0, 128], sizes = [16, 128], strides = [1, 1]} : vector<16x256xf32> to vector<16x128xf32>
    %6 = arith.negf %4 : vector<16x128xf32>
    %7 = math.exp %6 : vector<16x128xf32>
    %cst_4 = arith.constant 1.000000e+00 : f32
    %8 = vector.broadcast %cst_4 : f32 to vector<16x128xf32>
    %9 = arith.addf %8, %7 : vector<16x128xf32>
    %10 = arith.divf %8, %9 : vector<16x128xf32>
    %11 = arith.mulf %4, %10 : vector<16x128xf32>
    %12 = arith.mulf %11, %5 : vector<16x128xf32>
    %c0_5 = arith.constant 0 : index
    %c0_6 = arith.constant 0 : index
    %13 = vector.load %arg4[%c0_5, %c0_6] : memref<128x32xf32, #tpu.memory_space<vmem>>, vector<128x32xf32>
    %cst_7 = arith.constant dense<0.000000e+00> : vector<16x32xf32>
    %14 = tpu.matmul %12, %13, %cst_7 {dimension_numbers = #tpu.dot_dimension_numbers<[1], [0], [0], [1], [0, 0, 1, 1], [], []>} : vector<16x128xf32>, vector<128x32xf32>, vector<16x32xf32> -> vector<16x32xf32>
    %c0_i32 = arith.constant 0 : i32
    %15 = arith.cmpi eq, %arg1, %c0_i32 : i32
    %16 = arith.extui %15 : i1 to i32
    %c0_i32_8 = arith.constant 0 : i32
    %17 = arith.cmpi ne, %16, %c0_i32_8 : i32
    scf.if %17 {
      %c0_13 = arith.constant 0 : index
      %c0_14 = arith.constant 0 : index
      %24 = vector.load %arg6[%c0_13, %c0_14] : memref<16x32xf32, #tpu.memory_space<vmem>>, vector<16x32xf32>
      tpu.vector_store %arg6[%c0_13, %c0_14], %14 {strides = array<i32>} : memref<16x32xf32, #tpu.memory_space<vmem>>, vector<16x32xf32>,
    } else {
    }
    %c0_i32_9 = arith.constant 0 : i32
    %18 = arith.cmpi ne, %arg1, %c0_i32_9 : i32
    %19 = arith.extui %18 : i1 to i32
    %c0_i32_10 = arith.constant 0 : i32
    %20 = arith.cmpi ne, %19, %c0_i32_10 : i32
    scf.if %20 {
      %c0_13 = arith.constant 0 : index
      %c0_14 = arith.constant 0 : index
      %24 = vector.load %arg6[%c0_13, %c0_14] : memref<16x32xf32, #tpu.memory_space<vmem>>, vector<16x32xf32>
      %25 = arith.addf %24, %14 : vector<16x32xf32>
      %c0_15 = arith.constant 0 : index
      %c0_16 = arith.constant 0 : index
      %26 = vector.load %arg6[%c0_15, %c0_16] : memref<16x32xf32, #tpu.memory_space<vmem>>, vector<16x32xf32>
      tpu.vector_store %arg6[%c0_15, %c0_16], %25 {strides = array<i32>} : memref<16x32xf32, #tpu.memory_space<vmem>>, vector<16x32xf32>,
    } else {
    }
    %c0_i32_11 = arith.constant 0 : i32
    %21 = arith.cmpi eq, %arg1, %c0_i32_11 : i32
    %22 = arith.extui %21 : i1 to i32
    %c0_i32_12 = arith.constant 0 : i32
    %23 = arith.cmpi ne, %22, %c0_i32_12 : i32
    scf.if %23 {
      %c0_13 = arith.constant 0 : index
      %c0_14 = arith.constant 0 : index
      %24 = vector.load %arg6[%c0_13, %c0_14] : memref<16x32xf32, #tpu.memory_space<vmem>>, vector<16x32xf32>
      %c0_15 = arith.constant 0 : index
      %c0_16 = arith.constant 0 : index
      %25 = vector.load %arg5[%c0_15, %c0_16] : memref<16x32xf32, #tpu.memory_space<vmem>>, vector<16x32xf32>
      tpu.vector_store %arg5[%c0_15, %c0_16], %24 {strides = array<i32>} : memref<16x32xf32, #tpu.memory_space<vmem>>, vector<16x32xf32>,
    } else {
    }
    return
  }
  func.func @transform_0(%arg0: i32, %arg1: i32) -> (i32, i32) {
    %c0_i32 = arith.constant 0 : i32
    %c0_i32_0 = arith.constant 0 : i32
    return %arg0, %c0_i32 : i32, i32
  }
  func.func @transform_1(%arg0: i32, %arg1: i32) -> (i32, i32, i32) {
    %c0_i32 = arith.constant 0 : i32
    %c0_i32_0 = arith.constant 0 : i32
    %c0_i32_1 = arith.constant 0 : i32
    return %arg1, %c0_i32, %c0_i32_0 : i32, i32, i32
  }
  func.func @transform_2(%arg0: i32, %arg1: i32) -> (i32, i32) {
    %c0_i32 = arith.constant 0 : i32
    %c0_i32_0 = arith.constant 0 : i32
    return %arg1, %c0_i32 : i32, i32
  }
  func.func @transform_3(%arg0: i32, %arg1: i32) -> (i32, i32) {
    %c0_i32 = arith.constant 0 : i32
    %c0_i32_0 = arith.constant 0 : i32
    return %arg0, %c0_i32 : i32, i32
  }
}

</mosaic_0001>

<bundles_post_ra>
// kernel: tpu_custom_call.1
= control target key start
LH: loop header
LB: loop body
LE: loop exit
PB: predicated region body
PF: predicated region fallthrough
CT: control target
= control target key end

     0   :  { %v388_v7 = vmov 0.0   ;;  %s508_s0 = inlined_call_operand.vmem [shape: f32[16,32], index: 0, kind: input, shape index: {}]   ;;  %s509_s1 = inlined_call_operand.vmem [shape: f32[1,32,256], index: 1, kind: input, shape index: {}]   ;;  %s510_s2 = inlined_call_operand.vmem [shape: f32[128,32], index: 2, kind: input, shape index: {}]   ;;  %s511_s3 = inlined_call_operand.hbm [shape: f32[16,32], index: 3, kind: output, shape index: {}]  }
   0x1   :  { %v18_v0 = vld [vmem:[%s509_s1 + $0x8] sm:$0xff]  ;;  %v20_v1 = vld [vmem:[%s509_s1 + $0x18] sm:$0xff]  ;;  %v17_v2 = vld [vmem:[%s509_s1] sm:$0xff]  ;;  %96 = vmatprep.mubr.f32.mxu0 %v388_v7 }
   0x2   :  { %v312_v3 = vpack.c.bf16 %v20_v1, %v18_v0  ;;  %v19_v4 = vld [vmem:[%s509_s1 + $0x10] sm:$0xff]  ;;  %v22_v5 = vld [vmem:[%s509_s1 + $0x28] sm:$0xff]  ;;  %v24_v6 = vld [vmem:[%s509_s1 + $0x38] sm:$0xff] }
   0x3   :  { %v314_v8 = vpack.c.bf16 %v19_v4, %v17_v2  ;;  %v316_v9 = vpack.c.bf16 %v24_v6, %v22_v5  ;;  %v21_v10 = vld [vmem:[%s509_s1 + $0x20] sm:$0xff]  ;;  %v23_v11 = vld [vmem:[%s509_s1 + $0x30] sm:$0xff] }
   0x4   :  { %313 = vmatprep.subr.bf16.mxu0 %v312_v3 }
   0x5   :  { %8 = vsyncpa [#allocation4], 0  ;;  %315 = vmatpush1.bf16.msra.mxu0 %v314_v8  ;;  %v318_v12 = vpack.c.bf16 %v23_v11, %v21_v10  ;;  %v15_v13 = vld [vmem:[%s508_s0] sm:$0xff]  ;;  %vm25_vm0 = vcmask 261120   ;;  %v16_v14 = vld [vmem:[%s508_s0 + $0x8] sm:$0xff] }
   0x6   :  { %317 = vmatprep.subr.bf16.mxu0 %v316_v9  ;;  %v125_v15 = vld [vmem:[%s510_s2] sm:$0xff]  ;;  %v126_v16 = vld [vmem:[%s510_s2 + $0x8] sm:$0xff]  ;;  %v127_v18 = vld [vmem:[%s510_s2 + $0x10] sm:$0xff] }
   0x7   :  { %v320_v17 = vpack.c.bf16 %v126_v16, %v125_v15  ;;  %v128_v19 = vld [vmem:[%s510_s2 + $0x18] sm:$0xff]  ;;  %v129_v21 = vld [vmem:[%s510_s2 + $0x20] sm:$0xff]  ;;  %v130_v22 = vld [vmem:[%s510_s2 + $0x28] sm:$0xff] }
   0x8   :  { %v324_v20 = vpack.c.bf16 %v128_v19, %v127_v18  ;;  %v328_v23 = vpack.c.bf16 %v130_v22, %v129_v21  ;;  %v131_v24 = vld [vmem:[%s510_s2 + $0x30] sm:$0xff]  ;;  %v132_v25 = vld [vmem:[%s510_s2 + $0x38] sm:$0xff]  ;;  %v133_v27 = vld [vmem:[%s510_s2 + $0x40] sm:$0xff] }
   0x9   :  { %319 = vmatpush1.bf16.msra.mxu0 %v318_v12  ;;  %321 = vmatprep.subr.bf16.mxu1 %v320_v17  ;;  %v332_v26 = vpack.c.bf16 %v132_v25, %v131_v24  ;;  %v134_v28 = vld [vmem:[%s510_s2 + $0x48] sm:$0xff]  ;;  %v135_v30 = vld [vmem:[%s510_s2 + $0x50] sm:$0xff]  ;;  %v136_v31 = vld [vmem:[%s510_s2 + $0x58] sm:$0xff] }
   0xa   :  { %323 = vmatpush3.bf16.msra.mxu1 %v320_v17  ;;  %v336_v29 = vpack.c.bf16 %v134_v28, %v133_v27  ;;  %v340_v32 = vpack.c.bf16 %v136_v31, %v135_v30  ;;  %v137_v33 = vld [vmem:[%s510_s2 + $0x60] sm:$0xff]  ;;  %v138_v34 = vld [vmem:[%s510_s2 + $0x68] sm:$0xff]  ;;  %v139_v36 = vld [vmem:[%s510_s2 + $0x70] sm:$0xff] }
   0xb   :  { %325 = vmatprep.subr.bf16.mxu1 %v324_v20  ;;  %v344_v35 = vpack.c.bf16 %v138_v34, %v137_v33  ;;  %v140_v37 = vld [vmem:[%s510_s2 + $0x78] sm:$0xff]  ;;  %s389_s2 = smov [#allocation3]  }
   0xc   :  { %255 = vmatmul.mubr.msk.f32.vlgmr.msra.gmra.mrb[0].mxu0 %vm25_vm0, %v15_v13  ;;  %v348_v38 = vpack.c.bf16 %v140_v37, %v139_v36  ;;  %s244_s7 = sshll.u32 %s389_s2, 4  ;;  %s245_s7 = int_to_ptr.vmem [resolvable:$true] %s244_s7 }
   0xd   :  { %102 = vmatprep.mubr.f32.mxu0 %v388_v7  ;;  %s364_s8 = scalar_lea.vmem %s245_s7, 256  ;;  %p369_p1 = scmp.lt.s32.totalorder %s245_s7, %s245_s7 }
   0xe   :  { %327 = vmatpush3.bf16.msra.mxu1 %v324_v20  ;;  %p365_p0 = scmp.ne.s32.totalorder %s245_s7, %s364_s8  ;;  %p370_p2 = scmp.lt.s32.totalorder %s364_s8, %s364_s8 }
   0xf   :  { %329 = vmatprep.subr.bf16.mxu1 %v328_v23 }
  0x10   :  { %256 = vmatmul.mubr.msk.f32.gmra.mrb[2].mxu0 %vm25_vm0, %v16_v14  ;;  %p371_p3 = por %p370_p2, %p369_p1 }
  0x12   :  { %331 = vmatpush3.bf16.msra.mxu1 %v328_v23  ;;  %p372_p4 = pnand %p371_p3, %p365_p0 }
  0x13   :  { %333 = vmatprep.subr.bf16.mxu1 %v332_v26 }
  0x16   :  { %335 = vmatpush3.bf16.msra.mxu1 %v332_v26 }
  0x17   :  { %337 = vmatprep.subr.bf16.mxu1 %v336_v29 }
  0x1a   :  { %339 = vmatpush3.bf16.msra.mxu1 %v336_v29 }
  0x1b   :  { %341 = vmatprep.subr.bf16.mxu1 %v340_v32 }
  0x1e   :  { %343 = vmatpush3.bf16.msra.mxu1 %v340_v32 }
  0x1f   :  { %345 = vmatprep.subr.bf16.mxu1 %v344_v35 }
  0x22   :  { %347 = vmatpush3.bf16.msra.mxu1 %v344_v35 }
  0x23   :  { %349 = vmatprep.subr.bf16.mxu1 %v348_v38 }
  0x26   :  { %351 = vmatpush3.bf16.msra.mxu1 %v348_v38 }
  0xdf   :  { %v98_v39 = vpop.f32.mrb[0].mxu0 }
  0xe0   :  { %v257_v40 = vmul.f32 -1.442695, %v98_v39  ;;  %v100_v41 = vpop.f32.mrb[1].mxu0 }
  0xe2   :  { %356 = vpow2.f32 %v257_v40 }
  0xe3   :  { %v104_v42 = vpop.f32.mrb[2].mxu0 }
  0xe4   :  { %v258_v43 = vmul.f32 -1.442695, %v104_v42  ;;  %v106_v44 = vpop.f32.mrb[3].mxu0 }
  0xe6   :  { %358 = vpow2.f32 %v258_v43 }
  0xec   :  { %v357_v45 = vpop.eup %356 }
  0xed   :  { %v115_v46 = vadd.f32 1.0, %v357_v45 }
  0xef   :  { %360 = vrcp.f32 %v115_v46 }
  0xf0   :  { %v359_v47 = vpop.eup %358 }
  0xf1   :  { %v116_v48 = vadd.f32 1.0, %v359_v47 }
  0xf3   :  { %362 = vrcp.f32 %v116_v48 }
  0xf9   :  { %v361_v49 = vpop.eup %360 }
  0xfa   :  { %v121_v50 = vmul.f32 %v361_v49, %v98_v39 }
  0xfc   :  { %v123_v51 = vmul.f32 %v121_v50, %v100_v41 }
  0xfd   :  { %v363_v52 = vpop.eup %362 }
  0xfe   :  { %v122_v53 = vmul.f32 %v363_v52, %v104_v42  ;;  %309 = vmatprep.mubr.f32.mxu1 %v123_v51 }
 0x100   :  { %v124_v54 = vmul.f32 %v122_v53, %v106_v44 }
 0x102   :  { %310 = vmatmul.mubr.f32.vlgmr.msra.gmra.mrb[0].mxu1 %v124_v54 }
 0x1d5   :  { %v311_v55 = vpop.f32.mrb[0].mxu1 }
 0x1d6   :  { %221 = vst.msk [vmem:[#allocation2 + $0x8] sm:$0xff] %vm25_vm0, %v311_v55  ;;  %v207_v56 = vpop.f32.mrb[1].mxu1 }
 0x1d7   :  { %220 = vst.msk [vmem:[#allocation2] sm:$0xff] %vm25_vm0, %v207_v56 }
 0x1dd   :  { %v236_v57 = vld [vmem:[#allocation2 + $0x8] sm:$0xff] }
 0x1de   :  { %v235_v58 = vld [vmem:[#allocation2] sm:$0xff]  ;;  %238 = vst.msk [vmem:[#allocation3 + $0x8] sm:$0xff] %vm25_vm0, %v236_v57 }
 0x1df   :  { %237 = vst.msk [vmem:[#allocation3] sm:$0xff] %vm25_vm0, %v235_v58 }
 0x1e0   :  { %375 = shalt.err (!%p372_p4)
}
 0x1e1   :  { %s376_s11 = scalar_lea.hbm %s511_s3, 256 }
 0x1e2   :  { %p377_p5 = scmp.ne.s32.totalorder %s511_s3, %s376_s11  ;;  %p380_p6 = scmp.lt.u32.totalorder %s376_s11, %s511_s3 }
 0x1e4   :  { %p382_p7 = pnand %p380_p6, %p377_p5 }
 0x1e6   :  { %385 = shalt.err (!%p382_p7)
}
 0x1e7   :  { %s390_s15 = smov 128   ;;  %s391_s16 = smov 8  }
 0x1e8   :  { %250 = dma.vmem_to_hbm [thread:$0]  %s245_s7, 256, %s511_s3, [#allocation4], %s390_s15, %s390_s15, %s391_s16  }
 0x1e9   :  { %386 = dma.done.wait [#allocation4], 256  }
 0x1ea   :  { %387 = vsyncadd [#allocation4], 4294967040 }
 0x1eb   :  { %254 = vsyncpa [#allocation4], 1 }

</bundles_post_ra>
